<compile_context>
chip_gen: v6e
topology: v6e:2x2x1
jax: 0.10.0
libtpu: 0.0.40
codegen_flags: <defaults>
</compile_context>

<pallas_src>
import functools

import jax
import jax.numpy as jnp
from jax.experimental import pallas as pl
from jax.experimental.pallas import tpu as pltpu


# ----------------------------------------------------------------------------
# Fused SE kernel: one grid step per batch element.
#   x_ref : (1, C, HW)   activation for this batch element
#   w1_ref: (C, Cr)      fc1.weight.T   (z[j] = sum_c y[c] * w1[c, j])
#   w2_ref: (C, Cr)      fc2.weight     (s[c] = sum_j w2[c, j] * z[j])
#   o_ref : (1, C, HW)
# ----------------------------------------------------------------------------
def _se_kernel(x_ref, w1_ref, w2_ref, o_ref, *, C, HW):
    x = x_ref[0].astype(jnp.float32)                           # (C, HW)

    # Global average pool over spatial dims (lane reduce on the XLU).
    y = jnp.sum(x, axis=1, keepdims=True) * (1.0 / HW)         # (C, 1)

    # FC1 + ReLU, as VPU broadcast-multiply + sublane reduce (no M=1 MXU op).
    z = jnp.sum(y * w1_ref[...].astype(jnp.float32),
                axis=0, keepdims=True)                          # (1, Cr)
    z = jnp.maximum(z, 0.0)

    # FC2 + sigmoid, as VPU broadcast-multiply + lane reduce; sigmoid -> EUP.
    s = jnp.sum(w2_ref[...].astype(jnp.float32) * z,
                axis=1, keepdims=True)                          # (C, 1)
    s = jax.nn.sigmoid(s)

    # Channel-wise rescale of the input (lane-dense store, last dim = HW).
    o_ref[...] = (x * s).reshape(1, C, HW).astype(o_ref.dtype)


@jax.jit
def se_layer(x, fc1_w, fc2_w):
    """SELayer forward.

    x     : (B, C, H, W)   NCHW, matching the PyTorch module
    fc1_w : (Cr, C)        PyTorch fc1.weight (out, in), bias-free
    fc2_w : (C, Cr)        PyTorch fc2.weight (out, in), bias-free
    """
    B, C, H, W = x.shape
    Cr = fc1_w.shape[0]
    HW = H * W

    # (B, C, H, W) -> (B, C, H*W): free for contiguous NCHW, makes the last
    # (lane) dim a multiple of 128.
    x2 = x.reshape(B, C, HW)
    w1 = fc1_w.T          # (C, Cr)
    w2 = fc2_w            # (C, Cr)

    kernel = functools.partial(_se_kernel, C=C, HW=HW)
    out = pl.pallas_call(
        kernel,
        out_shape=jax.ShapeDtypeStruct((B, C, HW), x.dtype),
        grid=(B,),
        in_specs=[
            pl.BlockSpec((1, C, HW), lambda b: (b, 0, 0)),
            pl.BlockSpec((C, Cr), lambda b: (0, 0)),
            pl.BlockSpec((C, Cr), lambda b: (0, 0)),
        ],
        out_specs=pl.BlockSpec((1, C, HW), lambda b: (b, 0, 0)),
        compiler_params=pltpu.CompilerParams(
            dimension_semantics=("parallel",)),
    )(x2, w1, w2)
    return out.reshape(B, C, H, W)


# ----------------------------------------------------------------------------
# Pure-JAX reference (mirrors the PyTorch module exactly).
# ----------------------------------------------------------------------------
def se_layer_ref(x, fc1_w, fc2_w):
    y = jnp.mean(x, axis=(2, 3))                        # (B, C)
    z = jnp.maximum(y @ fc1_w.T, 0.0)                   # (B, Cr)
    s = jax.nn.sigmoid(z @ fc2_w.T)                     # (B, C)
    return x * s[:, :, None, None]


if __name__ == "__main__":
    key = jax.random.PRNGKey(0)
    k_x, k_w1, k_w2 = jax.random.split(key, 3)

    # Small deterministic example consistent with the module:
    # channel=64, reduction=16 -> reduced dim 4; NCHW input.
    B, C, H, W = 2, 64, 16, 16
    reduction = 16
    Cr = C // reduction

    x = jax.random.normal(k_x, (B, C, H, W), jnp.float32)
    # Deterministic stand-in for nn.Linear default init (bit-match not required).
    fc1_w = jax.random.normal(k_w1, (Cr, C), jnp.float32) * (1.0 / jnp.sqrt(C))
    fc2_w = jax.random.normal(k_w2, (C, Cr), jnp.float32) * (1.0 / jnp.sqrt(Cr))

    out = se_layer(x, fc1_w, fc2_w)
    out = jax.block_until_ready(out)

    ref = se_layer_ref(x, fc1_w, fc2_w)
    assert out.shape == (B, C, H, W)
    assert jnp.all(jnp.isfinite(out))
    assert jnp.allclose(out, ref, atol=1e-5, rtol=1e-5)
    print("KERNEL_OK")
</pallas_src>

<mosaic_0001>
module attributes {stable_mosaic.version = 11 : i64} {
  func.func @_se_kernel(%arg0: i32, %arg1: memref<1x64x256xf32, #tpu.memory_space<vmem>>, %arg2: memref<64x4xf32, #tpu.memory_space<vmem>>, %arg3: memref<64x4xf32, #tpu.memory_space<vmem>>, %arg4: memref<1x64x256xf32, #tpu.memory_space<vmem>>) attributes {dimension_semantics = [#tpu.dimension_semantics<parallel>], iteration_bounds = array<i64: 2>, scalar_prefetch = 0 : i64, scratch_operands = 0 : i64, tpu.core_type = #tpu.core_type<tc>, window_params = [{transform_indices = @transform_0, window_bounds = array<i64: 1, 64, 256>}, {pipeline_mode = #tpu.pipeline_mode<synchronous>, transform_indices = @transform_1, window_bounds = array<i64: 64, 4>}, {pipeline_mode = #tpu.pipeline_mode<synchronous>, transform_indices = @transform_2, window_bounds = array<i64: 64, 4>}, {transform_indices = @transform_3, window_bounds = array<i64: 1, 64, 256>}]} {
    %c0 = arith.constant 0 : index
    %c0_0 = arith.constant 0 : index
    %c0_1 = arith.constant 0 : index
    %0 = vector.load %arg1[%c0, %c0_0, %c0_1] : memref<1x64x256xf32, #tpu.memory_space<vmem>>, vector<1x64x256xf32>
    %1 = vector.shape_cast %0 : vector<1x64x256xf32> to vector<64x256xf32>
    %cst = arith.constant dense<0.000000e+00> : vector<64xf32>
    %2 = vector.multi_reduction <add>, %1, %cst [1] : vector<64x256xf32> to vector<64xf32>
    %3 = vector.shape_cast %2 : vector<64xf32> to vector<64x1xf32>
    %cst_2 = arith.constant 3.906250e-03 : f32
    %4 = vector.broadcast %cst_2 : f32 to vector<64x1xf32>
    %5 = arith.mulf %3, %4 : vector<64x1xf32>
    %c0_3 = arith.constant 0 : index
    %c0_4 = arith.constant 0 : index
    %6 = vector.load %arg2[%c0_3, %c0_4] : memref<64x4xf32, #tpu.memory_space<vmem>>, vector<64x4xf32>
    %7 = vector.broadcast %5 : vector<64x1xf32> to vector<64x4xf32>
    %8 = arith.mulf %7, %6 : vector<64x4xf32>
    %cst_5 = arith.constant dense<0.000000e+00> : vector<4xf32>
    %9 = vector.multi_reduction <add>, %8, %cst_5 [0] : vector<64x4xf32> to vector<4xf32>
    %10 = vector.shape_cast %9 : vector<4xf32> to vector<1x4xf32>
    %cst_6 = arith.constant 0.000000e+00 : f32
    %11 = vector.broadcast %cst_6 : f32 to vector<1x4xf32>
    %12 = arith.maximumf %10, %11 : vector<1x4xf32>
    %c0_7 = arith.constant 0 : index
    %c0_8 = arith.constant 0 : index
    %13 = vector.load %arg3[%c0_7, %c0_8] : memref<64x4xf32, #tpu.memory_space<vmem>>, vector<64x4xf32>
    %14 = vector.broadcast %12 : vector<1x4xf32> to vector<64x4xf32>
    %15 = arith.mulf %13, %14 : vector<64x4xf32>
    %cst_9 = arith.constant dense<0.000000e+00> : vector<64xf32>
    %16 = vector.multi_reduction <add>, %15, %cst_9 [1] : vector<64x4xf32> to vector<64xf32>
    %17 = vector.shape_cast %16 : vector<64xf32> to vector<64x1xf32>
    %18 = arith.negf %17 : vector<64x1xf32>
    %19 = math.exp %18 : vector<64x1xf32>
    %cst_10 = arith.constant 1.000000e+00 : f32
    %20 = vector.broadcast %cst_10 : f32 to vector<64x1xf32>
    %21 = arith.addf %20, %19 : vector<64x1xf32>
    %22 = arith.divf %20, %21 : vector<64x1xf32>
    %23 = vector.broadcast %22 : vector<64x1xf32> to vector<64x256xf32>
    %24 = arith.mulf %1, %23 : vector<64x256xf32>
    %25 = vector.shape_cast %24 : vector<64x256xf32> to vector<1x64x256xf32>
    %c0_11 = arith.constant 0 : index
    %c0_12 = arith.constant 0 : index
    %c0_13 = arith.constant 0 : index
    %26 = vector.load %arg4[%c0_11, %c0_12, %c0_13] : memref<1x64x256xf32, #tpu.memory_space<vmem>>, vector<1x64x256xf32>
    tpu.vector_store %arg4[%c0_11, %c0_12, %c0_13], %25 {strides = array<i32>} : memref<1x64x256xf32, #tpu.memory_space<vmem>>, vector<1x64x256xf32>,
    return
  }
  func.func @transform_0(%arg0: i32) -> (i32, i32, i32) {
    %c0_i32 = arith.constant 0 : i32
    %c0_i32_0 = arith.constant 0 : i32
    %c0_i32_1 = arith.constant 0 : i32
    return %arg0, %c0_i32, %c0_i32_0 : i32, i32, i32
  }
  func.func @transform_1(%arg0: i32) -> (i32, i32) {
    %c0_i32 = arith.constant 0 : i32
    %c0_i32_0 = arith.constant 0 : i32
    %c0_i32_1 = arith.constant 0 : i32
    return %c0_i32, %c0_i32_0 : i32, i32
  }
  func.func @transform_2(%arg0: i32) -> (i32, i32) {
    %c0_i32 = arith.constant 0 : i32
    %c0_i32_0 = arith.constant 0 : i32
    %c0_i32_1 = arith.constant 0 : i32
    return %c0_i32, %c0_i32_0 : i32, i32
  }
  func.func @transform_3(%arg0: i32) -> (i32, i32, i32) {
    %c0_i32 = arith.constant 0 : i32
    %c0_i32_0 = arith.constant 0 : i32
    %c0_i32_1 = arith.constant 0 : i32
    return %arg0, %c0_i32, %c0_i32_0 : i32, i32, i32
  }
}

</mosaic_0001>

<bundles_post_ra>
// kernel: se_layer.1
= control target key start
LH: loop header
LB: loop body
LE: loop exit
PB: predicated region body
PF: predicated region fallthrough
CT: control target
= control target key end

     0   :  { %s522_s12 = smov 0   ;;  %s692_s0 = inlined_call_operand.vmem [shape: f32[2,64,256], index: 0, kind: input, shape index: {}]   ;;  %s693_s1 = inlined_call_operand.vmem [shape: f32[64,4], index: 1, kind: input, shape index: {}]   ;;  %s694_s2 = inlined_call_operand.vmem [shape: f32[64,4], index: 2, kind: input, shape index: {}]   ;;  %s695_s3 = inlined_call_operand.vmem [shape: f32[2,64,256], index: 3, kind: output, shape index: {}]  }
   0x1 LB: > { %s433_s13 = sadd.s32 4294967295, %s500_s12   ;;  %p437_p0 = scmp.ge.s32.totalorder %s500_s12, 1  ;;  %s500_s12 = sphi %s522_s12, %s13_s12  }
   0x2   : > { %p137_p1 = scmp.lt.s32.totalorder %s500_s12, 3 }
   0x4   : > { %p138_p2 = pnand %p437_p0, %p137_p1 }
   0x5   : > { %p161_p3 = scmp.lt.s32.totalorder (!%p138_p2), %s433_s13, 1 }
   0x6   : > { %141 = sbr.rel (%p138_p2) target bundleno = 381 (0x17d), region = 32 }
   0xb   : > { %s697_s13 = smov (!%p161_p3, %s433_s13), 1  ;;  %v219_v27 = vld [vmem:[%s693_s1] sm:$0xff]  ;;  %v221_v29 = vld [vmem:[%s693_s1 + $0x10] sm:$0xff]  ;;  %v220_v30 = vld [vmem:[%s693_s1 + $0x8] sm:$0xff]  ;;  %vm235_vm0 = vcmask 31744  }
   0xc   : > { %s452_s14 = sshll.u32 %s697_s13, 7  ;;  %v222_v34 = vld [vmem:[%s693_s1 + $0x18] sm:$0xff]  ;;  %v223_v40 = vld [vmem:[%s693_s1 + $0x20] sm:$0xff]  ;;  %v224_v45 = vld [vmem:[%s693_s1 + $0x28] sm:$0xff] }
   0xd   : > { %s165_s17 = scalar_lea.vmem %s692_s0, %s452_s14  ;;  %v225_v54 = vld [vmem:[%s693_s1 + $0x30] sm:$0xff]  ;;  %v226_v58 = vld [vmem:[%s693_s1 + $0x38] sm:$0xff]  ;;  %s655_s28 = scalar_lea.vmem %s695_s3, %s452_s14 }
   0xe   : > { %v538_v0 = vld [vmem:[%s165_s17] sm:$0xff]  ;;  %v540_v1 = vld [vmem:[%s165_s17 + $0x8] sm:$0xff]  ;;  %v548_v5 = vld [vmem:[%s165_s17 + $0x10] sm:$0xff] }
   0xf   : > { %v542_v2 = vld [vmem:[%s165_s17 + $0x20] sm:$0xff]  ;;  %v187_v3 = vadd.f32 %v540_v1, %v538_v0  ;;  %v546_v4 = vld [vmem:[%s165_s17 + $0x28] sm:$0xff]  ;;  %v550_v6 = vld [vmem:[%s165_s17 + $0x18] sm:$0xff] }
  0x10   : > { %v193_v7 = vadd.f32 %v546_v4, %v542_v2  ;;  %v554_v8 = vld [vmem:[%s165_s17 + $0x30] sm:$0xff]  ;;  %v556_v9 = vld [vmem:[%s165_s17 + $0x38] sm:$0xff]  ;;  %v190_v10 = vadd.f32 %v550_v6, %v548_v5  ;;  %v562_v12 = vld [vmem:[%s165_s17 + $0x40] sm:$0xff] }
  0x11   : > { %188 = vadd.xlane.f32.xlu0 %v187_v3  ;;  %v196_v11 = vadd.f32 %v556_v9, %v554_v8  ;;  %v564_v13 = vld [vmem:[%s165_s17 + $0x48] sm:$0xff]  ;;  %v566_v14 = vld [vmem:[%s165_s17 + $0x50] sm:$0xff]  ;;  %v568_v15 = vld [vmem:[%s165_s17 + $0x58] sm:$0xff] }
  0x12   : > { %194 = vadd.xlane.f32.xlu1 %v193_v7  ;;  %v199_v16 = vadd.f32 %v564_v13, %v562_v12  ;;  %v202_v17 = vadd.f32 %v568_v15, %v566_v14  ;;  %v574_v18 = vld [vmem:[%s165_s17 + $0x60] sm:$0xff]  ;;  %v576_v19 = vld [vmem:[%s165_s17 + $0x68] sm:$0xff]  ;;  %v578_v20 = vld [vmem:[%s165_s17 + $0x70] sm:$0xff] }
  0x13   : > { %v580_v21 = vld [vmem:[%s165_s17 + $0x78] sm:$0xff]  ;;  %v205_v22 = vadd.f32 %v576_v19, %v574_v18 }
  0x14   : > { %v208_v23 = vadd.f32 %v580_v21, %v578_v20 }
  0x15   : > { %191 = vadd.xlane.f32.xlu0 %v190_v10 }
  0x16   : > { %197 = vadd.xlane.f32.xlu1 %v196_v11 }
  0x19   : > { %200 = vadd.xlane.f32.xlu0 %v199_v16 }
  0x1a   : > { %203 = vadd.xlane.f32.xlu1 %v202_v17 }
  0x1d   : > { %206 = vadd.xlane.f32.xlu0 %v205_v22 }
  0x1e   : > { %209 = vadd.xlane.f32.xlu1 %v208_v23 }
  0x9a   : > { %v189_v24 = vpop.xlane.xlu0 %188 }
  0x9b   : > { %v211_v25 = vmul.f32 0.00390625, %v189_v24  ;;  %v195_v26 = vpop.xlane.xlu1 %194 }
  0x9c   : > { %v213_v28 = vmul.f32 0.00390625, %v195_v26 }
  0x9d   : > { %v227_v32 = vmul.f32 %v219_v27, %v211_v25 }
  0x9e   : > { %v192_v31 = vpop.xlane.xlu0 %191  ;;  %v229_v37 = vmul.f32 %v221_v29, %v213_v28  ;;  %v259_v29 = vld [vmem:[%s694_s2 + $0x8] sm:$0xff] }
  0x9f   : > { %v212_v33 = vmul.f32 0.00390625, %v192_v31  ;;  %v198_v35 = vpop.xlane.xlu1 %197  ;;  %v236_v42 = vsel %vm235_vm0, %v227_v32, 0.0  ;;  %v261_v32 = vld [vmem:[%s694_s2 + $0x18] sm:$0xff] }
  0xa0   : > { %v214_v36 = vmul.f32 0.00390625, %v198_v35  ;;  %v239_v49 = vsel %vm235_vm0, %v229_v37, 0.0 }
  0xa1   : > { %v228_v38 = vmul.f32 %v220_v30, %v212_v33  ;;  %v258_v30 = vld [vmem:[%s694_s2] sm:$0xff]  ;;  %v260_v33 = vld [vmem:[%s694_s2 + $0x10] sm:$0xff] }
  0xa2   : > { %v230_v39 = vmul.f32 %v222_v34, %v214_v36  ;;  %v201_v41 = vpop.xlane.xlu0 %200 }
  0xa3   : > { %v237_v43 = vsel %vm235_vm0, %v228_v38, 0.0  ;;  %v215_v44 = vmul.f32 0.00390625, %v201_v41  ;;  %v204_v46 = vpop.xlane.xlu1 %203  ;;  %v262_v41 = vld [vmem:[%s694_s2 + $0x20] sm:$0xff] }
  0xa4   : > { %v238_v47 = vadd.f32 %v237_v43, %v236_v42  ;;  %v216_v48 = vmul.f32 0.00390625, %v204_v46  ;;  %v241_v50 = vsel %vm235_vm0, %v230_v39, 0.0  ;;  %v265_v46 = vld [vmem:[%s694_s2 + $0x38] sm:$0xff] }
  0xa5   : > { %v231_v51 = vmul.f32 %v223_v40, %v215_v44  ;;  %v263_v40 = vld [vmem:[%s694_s2 + $0x28] sm:$0xff] }
  0xa6   : > { %v240_v52 = vadd.f32 %v239_v49, %v238_v47  ;;  %v232_v53 = vmul.f32 %v224_v45, %v216_v48  ;;  %v207_v55 = vpop.xlane.xlu0 %206  ;;  %v264_v47 = vld [vmem:[%s694_s2 + $0x30] sm:$0xff] }
  0xa7   : > { %v243_v56 = vsel %vm235_vm0, %v231_v51, 0.0  ;;  %v217_v57 = vmul.f32 0.00390625, %v207_v55  ;;  %v210_v59 = vpop.xlane.xlu1 %209 }
  0xa8   : > { %v242_v60 = vadd.f32 %v241_v50, %v240_v52  ;;  %v218_v61 = vmul.f32 0.00390625, %v210_v59  ;;  %v245_v62 = vsel %vm235_vm0, %v232_v53, 0.0 }
  0xa9   : > { %v233_v63 = vmul.f32 %v225_v54, %v217_v57 }
  0xaa   : > { %v244_v3 = vadd.f32 %v243_v56, %v242_v60  ;;  %v234_v7 = vmul.f32 %v226_v58, %v218_v61 }
  0xab   : > { %v247_v10 = vsel %vm235_vm0, %v233_v63, 0.0 }
  0xac   : > { %v246_v11 = vadd.f32 %v245_v62, %v244_v3  ;;  %v249_v16 = vsel %vm235_vm0, %v234_v7, 0.0 }
  0xae   : > { %v248_v17 = vadd.f32 %v247_v10, %v246_v11 }
  0xb0   : > { %v250_v22 = vadd.f32 %v249_v16, %v248_v17 }
  0xb2   : > { %v251_v23 = vrot.slane %v250_v22, 4 }
  0xb4   : > { %v252_v24 = vadd.f32 %v251_v23, %v250_v22 }
  0xb6   : > { %v253_v25 = vrot.slane %v252_v24, 2 }
  0xb8   : > { %v254_v26 = vadd.f32 %v253_v25, %v252_v24 }
  0xba   : > { %v255_v27 = vrot.slane %v254_v26, 1 }
  0xbc   : > { %v256_v28 = vadd.f32 %v255_v27, %v254_v26 }
  0xbe   : > { %v257_v31 = vmax.f32 %v256_v28, 0.0 }
  0xc0   : > { %v267_v34 = vmul.f32 %v259_v29, %v257_v31  ;;  %v266_v35 = vmul.f32 %v258_v30, %v257_v31  ;;  %v269_v38 = vmul.f32 %v261_v32, %v257_v31  ;;  %v268_v39 = vmul.f32 %v260_v33, %v257_v31 }
  0xc1   : > { %v271_v44 = vmul.f32 %v263_v40, %v257_v31  ;;  %v270_v45 = vmul.f32 %v262_v41, %v257_v31  ;;  %v273_v50 = vmul.f32 %v265_v46, %v257_v31  ;;  %v272_v51 = vmul.f32 %v264_v47, %v257_v31 }
  0xc2   : > { %v277_v36 = vsel %vm235_vm0, %v267_v34, 0.0  ;;  %v274_v37 = vsel %vm235_vm0, %v266_v35, 0.0  ;;  %v283_v42 = vsel %vm235_vm0, %v269_v38, 0.0  ;;  %v280_v43 = vsel %vm235_vm0, %v268_v39, 0.0 }
  0xc3   : > { %278 = vadd.xlane.f32.xlu1 %v277_v36  ;;  %275 = vadd.xlane.f32.xlu0 %v274_v37  ;;  %v289_v48 = vsel %vm235_vm0, %v271_v44, 0.0  ;;  %v286_v49 = vsel %vm235_vm0, %v270_v45, 0.0  ;;  %v295_v52 = vsel %vm235_vm0, %v273_v50, 0.0  ;;  %v292_v53 = vsel %vm235_vm0, %v272_v51, 0.0 }
  0xc7   : > { %284 = vadd.xlane.f32.xlu1 %v283_v42  ;;  %281 = vadd.xlane.f32.xlu0 %v280_v43 }
  0xcb   : > { %290 = vadd.xlane.f32.xlu1 %v289_v48  ;;  %287 = vadd.xlane.f32.xlu0 %v286_v49 }
  0xcf   : > { %296 = vadd.xlane.f32.xlu1 %v295_v52  ;;  %293 = vadd.xlane.f32.xlu0 %v292_v53 }
 0x14c   : > { %v279_v54 = vpop.xlane.xlu1 %278  ;;  %v276_v55 = vpop.xlane.xlu0 %275 }
 0x14d   : > { %v443_v56 = vmul.f32 -1.442695, %v279_v54  ;;  %v442_v57 = vmul.f32 -1.442695, %v276_v55 }
 0x14f   : > { %462 = vpow2.f32 %v443_v56 }
 0x150   : > { %464 = vpow2.f32 %v442_v57  ;;  %v285_v58 = vpop.xlane.xlu1 %284  ;;  %v282_v59 = vpop.xlane.xlu0 %281 }
 0x151   : > { %v445_v60 = vmul.f32 -1.442695, %v285_v58  ;;  %v444_v61 = vmul.f32 -1.442695, %v282_v59 }
 0x153   : > { %466 = vpow2.f32 %v445_v60 }
 0x154   : > { %468 = vpow2.f32 %v444_v61  ;;  %v291_v62 = vpop.xlane.xlu1 %290  ;;  %v288_v63 = vpop.xlane.xlu0 %287 }
 0x155   : > { %v447_v3 = vmul.f32 -1.442695, %v291_v62  ;;  %v446_v7 = vmul.f32 -1.442695, %v288_v63 }
 0x157   : > { %470 = vpow2.f32 %v447_v3 }
 0x158   : > { %472 = vpow2.f32 %v446_v7  ;;  %v297_v10 = vpop.xlane.xlu1 %296  ;;  %v294_v11 = vpop.xlane.xlu0 %293 }
 0x159   : > { %v449_v16 = vmul.f32 -1.442695, %v297_v10  ;;  %v448_v17 = vmul.f32 -1.442695, %v294_v11 }
 0x15b   : > { %474 = vpow2.f32 %v449_v16 }
 0x15c   : > { %v463_v22 = vpop.eup %462  ;;  %476 = vpow2.f32 %v448_v17 }
 0x15d   : > { %v465_v23 = vpop.eup %464  ;;  %v323_v24 = vadd.f32 1.0, %v463_v22 }
 0x15e   : > { %v322_v25 = vadd.f32 1.0, %v465_v23 }
 0x15f   : > { %478 = vrcp.f32 %v323_v24 }
 0x160   : > { %v467_v26 = vpop.eup %466  ;;  %480 = vrcp.f32 %v322_v25 }
 0x161   : > { %v469_v27 = vpop.eup %468  ;;  %v325_v28 = vadd.f32 1.0, %v467_v26 }
 0x162   : > { %v324_v29 = vadd.f32 1.0, %v469_v27 }
 0x163   : > { %482 = vrcp.f32 %v325_v28 }
 0x164   : > { %v471_v30 = vpop.eup %470  ;;  %484 = vrcp.f32 %v324_v29 }
 0x165   : > { %v473_v31 = vpop.eup %472  ;;  %v327_v32 = vadd.f32 1.0, %v471_v30 }
 0x166   : > { %v326_v33 = vadd.f32 1.0, %v473_v31 }
 0x167   : > { %486 = vrcp.f32 %v327_v32 }
 0x168   : > { %v475_v34 = vpop.eup %474  ;;  %488 = vrcp.f32 %v326_v33 }
 0x169   : > { %v477_v35 = vpop.eup %476  ;;  %v329_v36 = vadd.f32 1.0, %v475_v34 }
 0x16a   : > { %v328_v37 = vadd.f32 1.0, %v477_v35 }
 0x16b   : > { %490 = vrcp.f32 %v329_v36 }
 0x16c   : > { %v479_v38 = vpop.eup %478  ;;  %492 = vrcp.f32 %v328_v37 }
 0x16d   : > { %v481_v39 = vpop.eup %480  ;;  %v348_v40 = vmul.f32 %v479_v38, %v548_v5  ;;  %v349_v41 = vmul.f32 %v479_v38, %v550_v6 }
 0x16e   : > { %v346_v42 = vmul.f32 %v481_v39, %v538_v0  ;;  %v347_v43 = vmul.f32 %v481_v39, %v540_v1 }
 0x16f   : > { %364 = vst [vmem:[%s655_s28 + $0x10] sm:$0xff] %v348_v40  ;;  %365 = vst [vmem:[%s655_s28 + $0x18] sm:$0xff] %v349_v41 }
 0x170   : > { %v483_v44 = vpop.eup %482  ;;  %362 = vst [vmem:[%s655_s28] sm:$0xff] %v346_v42  ;;  %363 = vst [vmem:[%s655_s28 + $0x8] sm:$0xff] %v347_v43 }
 0x171   : > { %v485_v45 = vpop.eup %484  ;;  %v352_v46 = vmul.f32 %v483_v44, %v554_v8  ;;  %v353_v5 = vmul.f32 %v483_v44, %v556_v9 }
 0x172   : > { %v350_v6 = vmul.f32 %v485_v45, %v542_v2  ;;  %v351_v0 = vmul.f32 %v485_v45, %v546_v4 }
 0x173   : > { %368 = vst [vmem:[%s655_s28 + $0x30] sm:$0xff] %v352_v46  ;;  %369 = vst [vmem:[%s655_s28 + $0x38] sm:$0xff] %v353_v5 }
 0x174   : > { %v487_v1 = vpop.eup %486  ;;  %366 = vst [vmem:[%s655_s28 + $0x20] sm:$0xff] %v350_v6  ;;  %367 = vst [vmem:[%s655_s28 + $0x28] sm:$0xff] %v351_v0 }
 0x175   : > { %v489_v47 = vpop.eup %488  ;;  %v356_v48 = vmul.f32 %v487_v1, %v566_v14  ;;  %v357_v8 = vmul.f32 %v487_v1, %v568_v15 }
 0x176   : > { %v354_v9 = vmul.f32 %v489_v47, %v562_v12  ;;  %v355_v2 = vmul.f32 %v489_v47, %v564_v13 }
 0x177   : > { %372 = vst [vmem:[%s655_s28 + $0x50] sm:$0xff] %v356_v48  ;;  %373 = vst [vmem:[%s655_s28 + $0x58] sm:$0xff] %v357_v8 }
 0x178   : > { %v491_v4 = vpop.eup %490  ;;  %370 = vst [vmem:[%s655_s28 + $0x40] sm:$0xff] %v354_v9  ;;  %371 = vst [vmem:[%s655_s28 + $0x48] sm:$0xff] %v355_v2 }
 0x179   : > { %v493_v49 = vpop.eup %492  ;;  %v360_v50 = vmul.f32 %v491_v4, %v578_v20  ;;  %v361_v51 = vmul.f32 %v491_v4, %v580_v21 }
 0x17a   : > { %v358_v14 = vmul.f32 %v493_v49, %v574_v18  ;;  %v359_v52 = vmul.f32 %v493_v49, %v576_v19 }
 0x17b   : > { %376 = vst [vmem:[%s655_s28 + $0x70] sm:$0xff] %v360_v50  ;;  %377 = vst [vmem:[%s655_s28 + $0x78] sm:$0xff] %v361_v51 }
 0x17c   : > { %374 = vst [vmem:[%s655_s28 + $0x60] sm:$0xff] %v358_v14  ;;  %375 = vst [vmem:[%s655_s28 + $0x68] sm:$0xff] %v359_v52 }
 0x17d PF: > { %s13_s12 = sadd.s32 1, %s500_s12  }
 0x17e   : > { %p10_p4 = scmp.ge.s32.totalorder %s13_s12, 4  }
 0x180   :  { %12 = sbr.rel (!%p10_p4) target bundleno = 1 (0x1), region = 62 }

</bundles_post_ra>
